<compile_context>
chip_gen: v7x
topology: tpu7x:2x2x1
jax: 0.10.0
libtpu: 0.0.40
codegen_flags: <defaults>
</compile_context>

<pallas_src>
import jax
import jax.numpy as jnp
from jax.experimental import pallas as pl
from jax.experimental.pallas import tpu as pltpu


def _round_up(x, m):
    return ((x + m - 1) // m) * m


def _cybsec_mlp_kernel(x_ref, w1_ref, w2_ref, w3_ref, b1_ref, b2_ref, b3_ref,
                       o_ref):
    # x arrives as f32 straight from HBM; cast to bf16 in-register (free under
    # DMA slack).  The (x + 1) / 2 input rescale is folded into w1/b1 on host.
    x = x_ref[...].astype(jnp.bfloat16)                        # (TM, F_IN)

    # Pretrained MLP: Linear -> ReLU -> Linear -> ReLU -> Linear.
    # bf16 operands into the MXU, f32 accumulation; elementwise stays f32.
    h1 = jnp.dot(x, w1_ref[...], preferred_element_type=jnp.float32) + b1_ref[...]
    h1 = jnp.maximum(h1, 0.0).astype(jnp.bfloat16)
    h2 = jnp.dot(h1, w2_ref[...], preferred_element_type=jnp.float32) + b2_ref[...]
    h2 = jnp.maximum(h2, 0.0).astype(jnp.bfloat16)
    logits = jnp.dot(h2, w3_ref[...], preferred_element_type=jnp.float32) + b3_ref[...]

    # QuantIdentity(quant_type='binary', bit_width=1, const scale 1.0):
    # hard sign to {-1, +1}.  Output block is the full (narrow) F_OUT width.
    o_ref[...] = jnp.where(logits >= 0.0, 1.0, -1.0).astype(o_ref.dtype)


def cybsec_mlp_forward(x, w1, b1, w2, b2, w3, b3, *, block_batch=8192):
    """x: (B, F_IN) float; weights stored as (in_features, out_features)."""
    B, F_IN = x.shape
    H1 = w1.shape[1]
    H2 = w2.shape[1]
    F_OUT = w3.shape[1]

    if x.dtype != jnp.float32:
        x = x.astype(jnp.float32)

    # --- host-side parameter prep (tiny, O(params)) ---
    # Fold (x + 1) * 0.5 into layer 1: W1' = 0.5*W1, b1' = b1 + 0.5*sum(W1).
    w1_fold = (0.5 * w1).astype(jnp.bfloat16)
    b1_fold = (b1 + 0.5 * jnp.sum(w1, axis=0, keepdims=True)).astype(jnp.float32)
    w2_b = w2.astype(jnp.bfloat16)
    w3_b = w3.astype(jnp.bfloat16)
    b2_f = b2.astype(jnp.float32)
    b3_f = b3.astype(jnp.float32)

    # --- adaptive batch tiling (no padding of x; partial last tile is masked) ---
    n_steps = pl.cdiv(B, block_batch)
    if n_steps < 2 and B >= 2048:
        n_steps = 2                      # give both v7x TensorCores a grid step
    TM = min(_round_up(pl.cdiv(B, n_steps), 8), _round_up(B, 8))
    grid = (pl.cdiv(B, TM),)

    flops = 2 * B * (F_IN * H1 + H1 * H2 + H2 * F_OUT)
    bytes_accessed = (x.size * 4
                      + (w1_fold.size + w2_b.size + w3_b.size) * 2
                      + (b1_fold.size + b2_f.size + b3_f.size) * 4
                      + B * F_OUT * 4)

    out = pl.pallas_call(
        _cybsec_mlp_kernel,
        out_shape=jax.ShapeDtypeStruct((B, F_OUT), jnp.float32),
        grid=grid,
        in_specs=[
            pl.BlockSpec((TM, F_IN), lambda i: (i, 0)),    # x: batch-tiled, f32
            pl.BlockSpec((F_IN, H1), lambda i: (0, 0)),    # weights resident
            pl.BlockSpec((H1, H2), lambda i: (0, 0)),
            pl.BlockSpec((H2, F_OUT), lambda i: (0, 0)),
            pl.BlockSpec((1, H1), lambda i: (0, 0)),       # biases resident
            pl.BlockSpec((1, H2), lambda i: (0, 0)),
            pl.BlockSpec((1, F_OUT), lambda i: (0, 0)),
        ],
        out_specs=pl.BlockSpec((TM, F_OUT), lambda i: (i, 0)),
        compiler_params=pltpu.CompilerParams(
            dimension_semantics=("parallel",),
            vmem_limit_bytes=32 * 1024 * 1024),
        cost_estimate=pl.CostEstimate(
            flops=flops, transcendentals=0, bytes_accessed=bytes_accessed),
    )(x, w1_fold, w2_b, w3_b, b1_fold, b2_f, b3_f)

    return out


if __name__ == "__main__":
    # Small shapes consistent with the MLP forward.
    B, F_IN, H1, H2, F_OUT = 8, 32, 64, 64, 16

    key = jax.random.PRNGKey(0)
    kx, k1, k2, k3, kb1, kb2, kb3 = jax.random.split(key, 7)

    # Bipolar-style input (the module expects values roughly in {-1, +1}).
    x = jnp.sign(jax.random.normal(kx, (B, F_IN), dtype=jnp.float32))
    x = jnp.where(x == 0.0, 1.0, x)

    # Deterministic synthetic "pretrained" MLP parameters.
    w1 = 0.1 * jax.random.normal(k1, (F_IN, H1), dtype=jnp.float32)
    b1 = 0.1 * jax.random.normal(kb1, (1, H1), dtype=jnp.float32)
    w2 = 0.1 * jax.random.normal(k2, (H1, H2), dtype=jnp.float32)
    b2 = 0.1 * jax.random.normal(kb2, (1, H2), dtype=jnp.float32)
    w3 = 0.1 * jax.random.normal(k3, (H2, F_OUT), dtype=jnp.float32)
    b3 = 0.1 * jax.random.normal(kb3, (1, F_OUT), dtype=jnp.float32)

    out = cybsec_mlp_forward(x, w1, b1, w2, b2, w3, b3)
    out = jax.block_until_ready(out)

    # Pure-f32 reference mirroring the PyTorch module exactly.
    x01 = (x + 1.0) / 2.0
    h = jnp.maximum(x01 @ w1 + b1, 0.0)
    h = jnp.maximum(h @ w2 + b2, 0.0)
    logits = h @ w3 + b3
    ref = jnp.where(logits >= 0.0, 1.0, -1.0)

    assert out.shape == (B, F_OUT)
    assert out.dtype == jnp.float32
    assert bool(jnp.all(jnp.abs(out) == 1.0))
    # bf16 weight rounding can only flip the hard sign for logits ~0; require an
    # exact match everywhere the f32 logit is clearly away from the boundary.
    decided = jnp.abs(logits) > 1e-3
    assert bool(jnp.all(jnp.where(decided, out == ref, True)))

    print("KERNEL_OK")
</pallas_src>

<mosaic_0001>
module attributes {stable_mosaic.version = 11 : i64} {
  func.func @_cybsec_mlp_kernel(%arg0: i32, %arg1: memref<8x32xf32, #tpu.memory_space<vmem>>, %arg2: memref<32x64xbf16, #tpu.memory_space<vmem>>, %arg3: memref<64x64xbf16, #tpu.memory_space<vmem>>, %arg4: memref<64x16xbf16, #tpu.memory_space<vmem>>, %arg5: memref<1x64xf32, #tpu.memory_space<vmem>>, %arg6: memref<1x64xf32, #tpu.memory_space<vmem>>, %arg7: memref<1x16xf32, #tpu.memory_space<vmem>>, %arg8: memref<8x16xf32, #tpu.memory_space<vmem>>) attributes {dimension_semantics = [#tpu.dimension_semantics<parallel>], iteration_bounds = array<i64: 1>, scalar_prefetch = 0 : i64, scratch_operands = 0 : i64, tpu.core_type = #tpu.core_type<tc>, window_params = [{transform_indices = @transform_0, window_bounds = array<i64: 8, 32>}, {pipeline_mode = #tpu.pipeline_mode<synchronous>, transform_indices = @transform_1, window_bounds = array<i64: 32, 64>}, {pipeline_mode = #tpu.pipeline_mode<synchronous>, transform_indices = @transform_2, window_bounds = array<i64: 64, 64>}, {pipeline_mode = #tpu.pipeline_mode<synchronous>, transform_indices = @transform_3, window_bounds = array<i64: 64, 16>}, {pipeline_mode = #tpu.pipeline_mode<synchronous>, transform_indices = @transform_4, window_bounds = array<i64: 1, 64>}, {pipeline_mode = #tpu.pipeline_mode<synchronous>, transform_indices = @transform_5, window_bounds = array<i64: 1, 64>}, {pipeline_mode = #tpu.pipeline_mode<synchronous>, transform_indices = @transform_6, window_bounds = array<i64: 1, 16>}, {transform_indices = @transform_7, window_bounds = array<i64: 8, 16>}]} {
    %c0 = arith.constant 0 : index
    %c0_0 = arith.constant 0 : index
    %0 = vector.load %arg1[%c0, %c0_0] : memref<8x32xf32, #tpu.memory_space<vmem>>, vector<8x32xf32>
    %1 = arith.truncf %0 : vector<8x32xf32> to vector<8x32xbf16>
    %c0_1 = arith.constant 0 : index
    %c0_2 = arith.constant 0 : index
    %2 = vector.load %arg2[%c0_1, %c0_2] : memref<32x64xbf16, #tpu.memory_space<vmem>>, vector<32x64xbf16>
    %cst = arith.constant dense<0.000000e+00> : vector<8x64xf32>
    %3 = tpu.matmul %1, %2, %cst {dimension_numbers = #tpu.dot_dimension_numbers<[1], [0], [0], [1], [0, 0, 1, 1], [], []>} : vector<8x32xbf16>, vector<32x64xbf16>, vector<8x64xf32> -> vector<8x64xf32>
    %c0_3 = arith.constant 0 : index
    %c0_4 = arith.constant 0 : index
    %4 = vector.load %arg5[%c0_3, %c0_4] : memref<1x64xf32, #tpu.memory_space<vmem>>, vector<1x64xf32>
    %5 = vector.broadcast %4 : vector<1x64xf32> to vector<8x64xf32>
    %6 = arith.addf %3, %5 : vector<8x64xf32>
    %cst_5 = arith.constant 0.000000e+00 : f32
    %7 = vector.broadcast %cst_5 : f32 to vector<8x64xf32>
    %8 = arith.maximumf %6, %7 : vector<8x64xf32>
    %9 = arith.truncf %8 : vector<8x64xf32> to vector<8x64xbf16>
    %c0_6 = arith.constant 0 : index
    %c0_7 = arith.constant 0 : index
    %10 = vector.load %arg3[%c0_6, %c0_7] : memref<64x64xbf16, #tpu.memory_space<vmem>>, vector<64x64xbf16>
    %cst_8 = arith.constant dense<0.000000e+00> : vector<8x64xf32>
    %11 = tpu.matmul %9, %10, %cst_8 {dimension_numbers = #tpu.dot_dimension_numbers<[1], [0], [0], [1], [0, 0, 1, 1], [], []>} : vector<8x64xbf16>, vector<64x64xbf16>, vector<8x64xf32> -> vector<8x64xf32>
    %c0_9 = arith.constant 0 : index
    %c0_10 = arith.constant 0 : index
    %12 = vector.load %arg6[%c0_9, %c0_10] : memref<1x64xf32, #tpu.memory_space<vmem>>, vector<1x64xf32>
    %13 = vector.broadcast %12 : vector<1x64xf32> to vector<8x64xf32>
    %14 = arith.addf %11, %13 : vector<8x64xf32>
    %cst_11 = arith.constant 0.000000e+00 : f32
    %15 = vector.broadcast %cst_11 : f32 to vector<8x64xf32>
    %16 = arith.maximumf %14, %15 : vector<8x64xf32>
    %17 = arith.truncf %16 : vector<8x64xf32> to vector<8x64xbf16>
    %c0_12 = arith.constant 0 : index
    %c0_13 = arith.constant 0 : index
    %18 = vector.load %arg4[%c0_12, %c0_13] : memref<64x16xbf16, #tpu.memory_space<vmem>>, vector<64x16xbf16>
    %cst_14 = arith.constant dense<0.000000e+00> : vector<8x16xf32>
    %19 = tpu.matmul %17, %18, %cst_14 {dimension_numbers = #tpu.dot_dimension_numbers<[1], [0], [0], [1], [0, 0, 1, 1], [], []>} : vector<8x64xbf16>, vector<64x16xbf16>, vector<8x16xf32> -> vector<8x16xf32>
    %c0_15 = arith.constant 0 : index
    %c0_16 = arith.constant 0 : index
    %20 = vector.load %arg7[%c0_15, %c0_16] : memref<1x16xf32, #tpu.memory_space<vmem>>, vector<1x16xf32>
    %21 = vector.broadcast %20 : vector<1x16xf32> to vector<8x16xf32>
    %22 = arith.addf %19, %21 : vector<8x16xf32>
    %cst_17 = arith.constant 0.000000e+00 : f32
    %23 = vector.broadcast %cst_17 : f32 to vector<8x16xf32>
    %24 = arith.cmpf oge, %22, %23 : vector<8x16xf32>
    %cst_18 = arith.constant 1.000000e+00 : f32
    %cst_19 = arith.constant -1.000000e+00 : f32
    %25 = vector.broadcast %cst_18 : f32 to vector<8x16xf32>
    %26 = vector.broadcast %cst_19 : f32 to vector<8x16xf32>
    %27 = arith.select %24, %25, %26 : vector<8x16xi1>, vector<8x16xf32>
    %c0_20 = arith.constant 0 : index
    %c0_21 = arith.constant 0 : index
    %28 = vector.load %arg8[%c0_20, %c0_21] : memref<8x16xf32, #tpu.memory_space<vmem>>, vector<8x16xf32>
    tpu.vector_store %arg8[%c0_20, %c0_21], %27 {strides = array<i32>} : memref<8x16xf32, #tpu.memory_space<vmem>>, vector<8x16xf32>,
    return
  }
  func.func @transform_0(%arg0: i32) -> (i32, i32) {
    %c0_i32 = arith.constant 0 : i32
    %c0_i32_0 = arith.constant 0 : i32
    return %arg0, %c0_i32 : i32, i32
  }
  func.func @transform_1(%arg0: i32) -> (i32, i32) {
    %c0_i32 = arith.constant 0 : i32
    %c0_i32_0 = arith.constant 0 : i32
    %c0_i32_1 = arith.constant 0 : i32
    return %c0_i32, %c0_i32_0 : i32, i32
  }
  func.func @transform_2(%arg0: i32) -> (i32, i32) {
    %c0_i32 = arith.constant 0 : i32
    %c0_i32_0 = arith.constant 0 : i32
    %c0_i32_1 = arith.constant 0 : i32
    return %c0_i32, %c0_i32_0 : i32, i32
  }
  func.func @transform_3(%arg0: i32) -> (i32, i32) {
    %c0_i32 = arith.constant 0 : i32
    %c0_i32_0 = arith.constant 0 : i32
    %c0_i32_1 = arith.constant 0 : i32
    return %c0_i32, %c0_i32_0 : i32, i32
  }
  func.func @transform_4(%arg0: i32) -> (i32, i32) {
    %c0_i32 = arith.constant 0 : i32
    %c0_i32_0 = arith.constant 0 : i32
    %c0_i32_1 = arith.constant 0 : i32
    return %c0_i32, %c0_i32_0 : i32, i32
  }
  func.func @transform_5(%arg0: i32) -> (i32, i32) {
    %c0_i32 = arith.constant 0 : i32
    %c0_i32_0 = arith.constant 0 : i32
    %c0_i32_1 = arith.constant 0 : i32
    return %c0_i32, %c0_i32_0 : i32, i32
  }
  func.func @transform_6(%arg0: i32) -> (i32, i32) {
    %c0_i32 = arith.constant 0 : i32
    %c0_i32_0 = arith.constant 0 : i32
    %c0_i32_1 = arith.constant 0 : i32
    return %c0_i32, %c0_i32_0 : i32, i32
  }
  func.func @transform_7(%arg0: i32) -> (i32, i32) {
    %c0_i32 = arith.constant 0 : i32
    %c0_i32_0 = arith.constant 0 : i32
    return %arg0, %c0_i32 : i32, i32
  }
}

</mosaic_0001>

<bundles_post_ra>
// kernel: tpu_custom_call.1
= control target key start
LH: loop header
LB: loop body
LE: loop exit
PB: predicated region body
PF: predicated region fallthrough
CT: control target
= control target key end

     0   :  { %12 = vsyncpa [#allocation3], 0  ;;  %s537_s0 = inlined_call_operand.vmem [shape: f32[8,32], index: 0, kind: input, shape index: {}]   ;;  %s538_s1 = inlined_call_operand.hbm [shape: bf16[32,64], index: 1, kind: input, shape index: {}]   ;;  %s539_s2 = inlined_call_operand.vmem [shape: bf16[64,64], index: 2, kind: input, shape index: {}]   ;;  %s540_s3 = inlined_call_operand.vmem [shape: bf16[64,16], index: 3, kind: input, shape index: {}]   ;;  %s541_s4 = inlined_call_operand.vmem [shape: f32[1,64], index: 4, kind: input, shape index: {}]   ;;  %s542_s5 = inlined_call_operand.vmem [shape: f32[1,64], index: 5, kind: input, shape index: {}]   ;;  %s543_s6 = inlined_call_operand.vmem [shape: f32[1,16], index: 6, kind: input, shape index: {}]   ;;  %s544_s7 = inlined_call_operand.hbm [shape: f32[8,16], index: 7, kind: output, shape index: {}]  }
   0x1   :  { %13 = vsyncpa [#allocation4], 0  ;;  %s425_s24 = smov [#allocation2]   ;;  %s377_s28 = scalar_lea.hbm %s538_s1, 256 }
   0x2   :  { %s21_s25 = sshll.u32 %s425_s24, 4  ;;  %p378_p0 = scmp.ne.s32.totalorder %s538_s1, %s377_s28  ;;  %s22_s25 = int_to_ptr.vmem [resolvable:$true] %s21_s25 }
   0x3   :  { %p381_p1 = scmp.lt.u32.totalorder %s377_s28, %s538_s1 }
   0x5   :  { %p383_p2 = pnand %p381_p1, %p378_p0 }
   0x7   :  { %386 = shalt.err (!%p383_p2)
}
   0x8   :  { %s387_s10 = scalar_lea.vmem %s22_s25, 256  ;;  %p392_p4 = scmp.lt.s32.totalorder %s22_s25, %s22_s25 }
   0x9   :  { %p388_p3 = scmp.ne.s32.totalorder %s22_s25, %s387_s10  ;;  %p393_p5 = scmp.lt.s32.totalorder %s387_s10, %s387_s10 }
   0xb   :  { %p394_p6 = por %p393_p5, %p392_p4 }
   0xd   :  { %p395_p7 = pnand %p394_p6, %p388_p3 }
   0xf   :  { %398 = shalt.err (!%p395_p7)
}
  0x10   :  { %s426_s11 = smov 64   ;;  %s427_s12 = smov 4  }
  0x11   :  { %27 = dma.hbm_to_vmem [thread:$0]  %s538_s1, 256, %s22_s25, [#allocation3], %s426_s11, %s426_s11, %s427_s12  }
  0x12   :  { %421 = dma.done.wait [#allocation3], 256  }
  0x13   :  { %422 = vsyncadd [#allocation3], 4294967040  ;;  %v428_v0 = vmov 0.0   ;;  %vm429_vm0 = vmmov 0   ;;  %v367_v1 = vld [vmem:[#allocation2] sm:$0xff]   ;;  %v368_v2 = vld [vmem:[#allocation2 + $0x8] sm:$0xff]  }
  0x14   :  { %328 = vmatprep.subr.bf16.mxu0 %v428_v0  ;;  %332 = vmatprep.mubr.msk.bf16.mxu0 %vm429_vm0, %v428_v0  ;;  %v42_v3 = vld [vmem:[%s537_s0] sm:$0xff]  ;;  %vm67_vm1 = vcmask 261120   ;;  %v370_v5 = vld [vmem:[%s539_s2 + $0x8] sm:$0xff]   ;;  %v371_v7 = vld [vmem:[%s539_s2 + $0x10] sm:$0xff]   ;;  %vm152_vm2 = vcmask 523264   ;;  %vm282_vm3 = vcmask 130048  }
  0x15   :  { %336 = vmatprep.subr.bf16.mxu1 %v428_v0  ;;  %344 = vmatprep.mubr.msk.bf16.mxu1 %vm429_vm0, %v428_v0  ;;  %v369_v4 = vld [vmem:[%s539_s2] sm:$0xff]   ;;  %v43_v6 = vpack.c.bf16 %v42_v3, %v42_v3  ;;  %v372_v8 = vld [vmem:[%s539_s2 + $0x18] sm:$0xff]   ;;  %v374_v10 = vld [vmem:[%s540_s3 + $0x8] sm:$0xff]   ;;  %v431_v35 = vmov -1.0  }
  0x16   :  { %329 = vmatpush3.bf16.msra.mxu0 %v367_v1  ;;  %337 = vmatpush3.bf16.msra.mxu1 %v369_v4  ;;  %v373_v9 = vld [vmem:[%s540_s3] sm:$0xff]   ;;  %v375_v19 = vld [vmem:[%s540_s3 + $0x10] sm:$0xff]   ;;  %v376_v20 = vld [vmem:[%s540_s3 + $0x18] sm:$0xff]   ;;  %s430_s3 = smov [#allocation5]  }
  0x17   :  { %330 = vmatprep.subr.bf16.mxu0 %v428_v0  ;;  %338 = vmatprep.subr.bf16.mxu1 %v428_v0  ;;  %v299_v11 = vld [vmem:[%s541_s4] ss:$0 sm:$0xff]  ;;  %s290_s12 = sshll.u32 %s430_s3, 4  ;;  %s291_s12 = int_to_ptr.vmem [resolvable:$true] %s290_s12 }
  0x18   :  { %v303_v21 = vld [vmem:[%s542_s5] ss:$0 sm:$0xff]  ;;  %s399_s5 = scalar_lea.vmem %s291_s12, 128  ;;  %p404_p9 = scmp.lt.s32.totalorder %s291_s12, %s291_s12 }
  0x19   :  { %v309_v29 = vld [vmem:[%s543_s6] ss:$0 sm:$0xff]  ;;  %p400_p8 = scmp.ne.s32.totalorder %s291_s12, %s399_s5  ;;  %p405_p10 = scmp.lt.s32.totalorder %s399_s5, %s399_s5 }
  0x1a   :  { %331 = vmatpush3.bf16.msra.mxu0 %v368_v2  ;;  %339 = vmatpush3.bf16.msra.mxu1 %v370_v5 }
  0x1b   :  { %348 = vmatprep.subr.bf16.mxu0 %v428_v0  ;;  %340 = vmatprep.subr.bf16.mxu1 %v428_v0  ;;  %p406_p11 = por %p405_p10, %p404_p9 }
  0x1d   :  { %333 = vmatmul.mubr.msk.bf16.vlgmr.msra.gmra.mrb[0].mxu0 %vm67_vm1, %v43_v6  ;;  %p407_p12 = pnand %p406_p11, %p400_p8 }
  0x1e   :  { %356 = vmatprep.mubr.msk.bf16.mxu0 %vm429_vm0, %v428_v0  ;;  %341 = vmatpush3.bf16.msra.mxu1 %v371_v7 }
  0x1f   :  { %342 = vmatprep.subr.bf16.mxu1 %v428_v0  ;;  %349 = vmatpush3.bf16.msra.mxu0 %v373_v9 }
  0x20   :  { %350 = vmatprep.subr.bf16.mxu0 %v428_v0 }
  0x22   :  { %343 = vmatpush3.bf16.msra.mxu1 %v372_v8 }
  0x23   :  { %351 = vmatpush3.bf16.msra.mxu0 %v374_v10 }
  0x24   :  { %352 = vmatprep.subr.bf16.mxu0 %v428_v0 }
  0x27   :  { %353 = vmatpush3.bf16.msra.mxu0 %v375_v19 }
  0x28   :  { %354 = vmatprep.subr.bf16.mxu0 %v428_v0 }
  0x2b   :  { %355 = vmatpush3.bf16.msra.mxu0 %v376_v20 }
  0xf0   :  { %v105_v12 = vpop.f32.mrb[0].mxu0 }
  0xf1   :  { %v106_v13 = vadd.f32 %v299_v11, %v105_v12  ;;  %v334_v14 = vpop.f32.mrb[1].mxu0 }
  0xf2   :  { %v108_v15 = vpop.f32.mrb[2].mxu0 }
  0xf3   :  { %v111_v16 = vmax.f32 %v106_v13, 0.0  ;;  %v335_v17 = vpop.f32.mrb[3].mxu0 }
  0xf5   :  { %v112_v18 = vpack.c.bf16 %v111_v16, %v111_v16 }
  0xf7   :  { %345 = vmatmul.mubr.msk.bf16.vlgmr.msra.gmra.mrb[0].mxu1 %vm152_vm2, %v112_v18 }
 0x1ca   :  { %v190_v22 = vpop.f32.mrb[0].mxu1 }
 0x1cb   :  { %v191_v23 = vadd.f32 %v303_v21, %v190_v22  ;;  %v346_v24 = vpop.f32.mrb[1].mxu1 }
 0x1cc   :  { %v193_v25 = vpop.f32.mrb[2].mxu1 }
 0x1cd   :  { %v196_v26 = vmax.f32 %v191_v23, 0.0  ;;  %v347_v27 = vpop.f32.mrb[3].mxu1 }
 0x1cf   :  { %v197_v28 = vpack.c.bf16 %v196_v26, %v196_v26 }
 0x1d1   :  { %357 = vmatmul.mubr.msk.bf16.vlgmr.msra.gmra.mrb[4].mxu0 %vm152_vm2, %v197_v28 }
 0x2a4   :  { %v274_v30 = vpop.f32.mrb[4].mxu0 }
 0x2a5   :  { %v275_v31 = vadd.f32 %v309_v29, %v274_v30  ;;  %v358_v32 = vpop.f32.mrb[5].mxu0 }
 0x2a6   :  { %v277_v33 = vpop.f32.mrb[6].mxu0 }
 0x2a7   :  { %vm280_vm4 = vcmp.ge.f32.partialorder %v275_v31, 0.0  ;;  %v359_v34 = vpop.f32.mrb[7].mxu0 }
 0x2a8   :  { %v281_v36 = vsel %vm280_vm4, 1.0, %v431_v35 }
 0x2a9   :  { %283 = vst.msk [vmem:[#allocation5] sm:$0xff] %vm282_vm3, %v281_v36 }
 0x2aa   :  { %410 = shalt.err (!%p407_p12)
}
 0x2ab   :  { %s411_s14 = scalar_lea.hbm %s544_s7, 128 }
 0x2ac   :  { %p412_p13 = scmp.ne.s32.totalorder %s544_s7, %s411_s14  ;;  %p415_p0 = scmp.lt.u32.totalorder %s411_s14, %s544_s7 }
 0x2ae   :  { %p417_p1 = pnand %p415_p0, %p412_p13 }
 0x2b0   :  { %420 = shalt.err (!%p417_p1)
}
 0x2b1   :  { %293 = dma.vmem_to_hbm [thread:$0]  %s291_s12, 128, %s544_s7, [#allocation4]  }
 0x2b2   :  { %423 = dma.done.wait [#allocation4], 128  }
 0x2b3   :  { %424 = vsyncadd [#allocation4], 4294967168 }
 0x2b4   :  { %297 = vsyncpa [#allocation3], 1 }
 0x2b5   :  { %298 = vsyncpa [#allocation4], 1 }

</bundles_post_ra>
